<compile_context>
chip_gen: v6e
topology: v6e:2x2x1
jax: 0.10.0
libtpu: 0.0.40
codegen_flags: <defaults>
</compile_context>

<pallas_src>
import math
from functools import partial

import jax
import jax.numpy as jnp
from jax.experimental import pallas as pl
from jax.experimental.pallas import tpu as pltpu


def _layernorm_kernel(eps, x_ref, gb_ref, o_ref):
    x = x_ref[...].astype(jnp.float32)                  # (tile_rows, D)
    g = gb_ref[0:1, :]                                  # (1, D)
    b = gb_ref[1:2, :]                                  # (1, D)

    d = x.shape[-1]
    mean = jnp.mean(x, axis=-1, keepdims=True)          # (tile_rows, 1)
    xc = x - mean
    # torch.std default: unbiased (divide by N-1)
    var = jnp.sum(xc * xc, axis=-1, keepdims=True) / jnp.float32(d - 1)
    std = jnp.sqrt(var)
    inv = 1.0 / (std + jnp.float32(eps))                # one recip per row
    o_ref[...] = (g * (xc * inv) + b).astype(o_ref.dtype)


def layer_norm(x, gamma, beta, eps=1e-6, block_rows=1024):
    """LayerNorm over the last axis of x (any leading shape), torch semantics."""
    orig_shape = x.shape
    D = orig_shape[-1]
    R = int(math.prod(orig_shape[:-1])) if len(orig_shape) > 1 else 1
    x2 = x.reshape(R, D)

    # Fold everything into one row axis; pick the biggest row tile that is a
    # multiple of 8 (sublane) and <= block_rows, pad rows to a whole number of tiles.
    tr = min(block_rows, pl.cdiv(R, 8) * 8)
    R_pad = pl.cdiv(R, tr) * tr
    if R_pad != R:
        x2 = jnp.pad(x2, ((0, R_pad - R), (0, 0)))
    n_tiles = R_pad // tr

    # gamma/beta packed into one (2, D) ref -> single DMA per pipeline step.
    gb = jnp.stack([gamma.astype(jnp.float32), beta.astype(jnp.float32)], axis=0)

    out = pl.pallas_call(
        partial(_layernorm_kernel, float(eps)),
        out_shape=jax.ShapeDtypeStruct((R_pad, D), x.dtype),
        grid=(n_tiles,),
        in_specs=[
            pl.BlockSpec((tr, D), lambda i: (i, 0)),     # activation row-tile
            pl.BlockSpec((2, D), lambda i: (0, 0)),      # packed gamma/beta
        ],
        out_specs=pl.BlockSpec((tr, D), lambda i: (i, 0)),
        compiler_params=pltpu.CompilerParams(
            dimension_semantics=("parallel",)),          # lets v7x split rows across TCs
    )(x2, gb)

    return out[:R].reshape(orig_shape)


def _reference(x, gamma, beta, eps=1e-6):
    """Pure-JAX reference with exact torch semantics (unbiased std, eps on std)."""
    mean = jnp.mean(x, axis=-1, keepdims=True)
    std = jnp.std(x, axis=-1, keepdims=True, ddof=1)
    return gamma * (x - mean) / (std + eps) + beta


if __name__ == "__main__":
    key = jax.random.PRNGKey(0)
    kx, kg, kb, kx2 = jax.random.split(key, 4)

    # Primary small example: (batch=2, seq=8, features=128) — lane-dense feature dim.
    B, N, D = 2, 8, 128
    x = jax.random.normal(kx, (B, N, D), jnp.float32)
    gamma = jnp.ones((D,), jnp.float32) + 0.1 * jax.random.normal(kg, (D,), jnp.float32)
    beta = 0.1 * jax.random.normal(kb, (D,), jnp.float32)

    out = layer_norm(x, gamma, beta, eps=1e-6)
    jax.block_until_ready(out)
    assert out.shape == x.shape
    assert jnp.allclose(out, _reference(x, gamma, beta), atol=1e-5, rtol=1e-5)

    # Second call with an unaligned shape to exercise row padding / narrow features.
    B2, N2, D2 = 3, 5, 32
    x2 = jax.random.normal(kx2, (B2, N2, D2), jnp.float32)
    g2 = jnp.ones((D2,), jnp.float32)
    b2 = jnp.zeros((D2,), jnp.float32)
    out2 = layer_norm(x2, g2, b2, eps=1e-6)
    jax.block_until_ready(out2)
    assert out2.shape == x2.shape
    assert jnp.allclose(out2, _reference(x2, g2, b2), atol=1e-5, rtol=1e-5)

    print("KERNEL_OK")
</pallas_src>

<mosaic_0001>
module attributes {stable_mosaic.version = 11 : i64} {
  func.func @_layernorm_kernel(%arg0: i32, %arg1: memref<16x128xf32, #tpu.memory_space<vmem>>, %arg2: memref<2x128xf32, #tpu.memory_space<vmem>>, %arg3: memref<16x128xf32, #tpu.memory_space<vmem>>) attributes {dimension_semantics = [#tpu.dimension_semantics<parallel>], iteration_bounds = array<i64: 1>, scalar_prefetch = 0 : i64, scratch_operands = 0 : i64, tpu.core_type = #tpu.core_type<tc>, window_params = [{transform_indices = @transform_0, window_bounds = array<i64: 16, 128>}, {pipeline_mode = #tpu.pipeline_mode<synchronous>, transform_indices = @transform_1, window_bounds = array<i64: 2, 128>}, {transform_indices = @transform_2, window_bounds = array<i64: 16, 128>}]} {
    %c0 = arith.constant 0 : index
    %c0_0 = arith.constant 0 : index
    %0 = vector.load %arg1[%c0, %c0_0] : memref<16x128xf32, #tpu.memory_space<vmem>>, vector<16x128xf32>
    %c0_1 = arith.constant 0 : index
    %c0_2 = arith.constant 0 : index
    %1 = vector.load %arg2[%c0_1, %c0_2] : memref<2x128xf32, #tpu.memory_space<vmem>>, vector<1x128xf32>
    %c1 = arith.constant 1 : index
    %c0_3 = arith.constant 0 : index
    %2 = vector.load %arg2[%c1, %c0_3] : memref<2x128xf32, #tpu.memory_space<vmem>>, vector<1x128xf32>
    %cst = arith.constant dense<0.000000e+00> : vector<16xf32>
    %3 = vector.multi_reduction <add>, %0, %cst [1] : vector<16x128xf32> to vector<16xf32>
    %4 = vector.shape_cast %3 : vector<16xf32> to vector<16x1xf32>
    %cst_4 = arith.constant 1.280000e+02 : f32
    %5 = vector.broadcast %cst_4 : f32 to vector<16x1xf32>
    %6 = arith.divf %4, %5 : vector<16x1xf32>
    %7 = vector.broadcast %6 : vector<16x1xf32> to vector<16x128xf32>
    %8 = arith.subf %0, %7 : vector<16x128xf32>
    %9 = arith.mulf %8, %8 : vector<16x128xf32>
    %cst_5 = arith.constant dense<0.000000e+00> : vector<16xf32>
    %10 = vector.multi_reduction <add>, %9, %cst_5 [1] : vector<16x128xf32> to vector<16xf32>
    %11 = vector.shape_cast %10 : vector<16xf32> to vector<16x1xf32>
    %cst_6 = arith.constant 1.270000e+02 : f32
    %12 = vector.broadcast %cst_6 : f32 to vector<16x1xf32>
    %13 = arith.divf %11, %12 : vector<16x1xf32>
    %14 = math.sqrt %13 : vector<16x1xf32>
    %cst_7 = arith.constant 9.99999997E-7 : f32
    %15 = vector.broadcast %cst_7 : f32 to vector<16x1xf32>
    %16 = arith.addf %14, %15 : vector<16x1xf32>
    %cst_8 = arith.constant 1.000000e+00 : f32
    %17 = vector.broadcast %cst_8 : f32 to vector<16x1xf32>
    %18 = arith.divf %17, %16 : vector<16x1xf32>
    %19 = vector.broadcast %18 : vector<16x1xf32> to vector<16x128xf32>
    %20 = arith.mulf %8, %19 : vector<16x128xf32>
    %21 = vector.broadcast %1 : vector<1x128xf32> to vector<16x128xf32>
    %22 = arith.mulf %21, %20 : vector<16x128xf32>
    %23 = vector.broadcast %2 : vector<1x128xf32> to vector<16x128xf32>
    %24 = arith.addf %22, %23 : vector<16x128xf32>
    %c0_9 = arith.constant 0 : index
    %c0_10 = arith.constant 0 : index
    %25 = vector.load %arg3[%c0_9, %c0_10] : memref<16x128xf32, #tpu.memory_space<vmem>>, vector<16x128xf32>
    tpu.vector_store %arg3[%c0_9, %c0_10], %24 {strides = array<i32>} : memref<16x128xf32, #tpu.memory_space<vmem>>, vector<16x128xf32>,
    return
  }
  func.func @transform_0(%arg0: i32) -> (i32, i32) {
    %c0_i32 = arith.constant 0 : i32
    %c0_i32_0 = arith.constant 0 : i32
    return %arg0, %c0_i32 : i32, i32
  }
  func.func @transform_1(%arg0: i32) -> (i32, i32) {
    %c0_i32 = arith.constant 0 : i32
    %c0_i32_0 = arith.constant 0 : i32
    %c0_i32_1 = arith.constant 0 : i32
    return %c0_i32, %c0_i32_0 : i32, i32
  }
  func.func @transform_2(%arg0: i32) -> (i32, i32) {
    %c0_i32 = arith.constant 0 : i32
    %c0_i32_0 = arith.constant 0 : i32
    return %arg0, %c0_i32 : i32, i32
  }
}

</mosaic_0001>

<bundles_post_ra>
// kernel: tpu_custom_call.1
= control target key start
LH: loop header
LB: loop body
LE: loop exit
PB: predicated region body
PF: predicated region fallthrough
CT: control target
= control target key end

     0   :  { %7 = vsyncpa [#allocation3], 0  ;;  %s230_s0 = inlined_call_operand.hbm [shape: f32[16,128], index: 0, kind: input, shape index: {}]   ;;  %s231_s1 = inlined_call_operand.hbm [shape: f32[2,128], index: 1, kind: input, shape index: {}]   ;;  %s232_s2 = inlined_call_operand.hbm [shape: f32[16,128], index: 2, kind: output, shape index: {}]  }
   0x1   :  { %8 = vsyncpa [#allocation6], 0 }
   0x2   :  { %9 = vsyncpa [#allocation4], 0  ;;  %s195_s9 = smov [#allocation2]  }
   0x3   :  { %s15_s10 = sshll.u32 %s195_s9, 4  ;;  %s16_s10 = int_to_ptr.vmem [resolvable:$true] %s15_s10 }
   0x4   :  { %s137_s11 = scalar_lea.vmem %s16_s10, 256  ;;  %p142_p1 = scmp.lt.s32.totalorder %s16_s10, %s16_s10 }
   0x5   :  { %p138_p0 = scmp.ne.s32.totalorder %s16_s10, %s137_s11  ;;  %p143_p2 = scmp.lt.s32.totalorder %s137_s11, %s137_s11 }
   0x7   :  { %p144_p3 = por %p143_p2, %p142_p1 }
   0x9   :  { %p145_p4 = pnand %p144_p3, %p138_p0 }
   0xb   :  { %148 = shalt.err (!%p145_p4)
}
   0xc   :  { %s196_s12 = smov 128   ;;  %s197_s13 = smov 8  }
   0xd   :  { %21 = dma.hbm_to_vmem [thread:$0]  %s230_s0, 256, %s16_s10, [#allocation3], %s196_s12, %s196_s12, %s197_s13  }
   0xe   :  { %s198_s16 = smov [#allocation5]  }
   0xf   :  { %s28_s17 = sshll.u32 %s198_s16, 4  ;;  %s29_s17 = int_to_ptr.vmem [resolvable:$true] %s28_s17 }
  0x10   :  { %s157_s18 = scalar_lea.vmem %s29_s17, 32  ;;  %p162_p6 = scmp.lt.s32.totalorder %s29_s17, %s29_s17 }
  0x11   :  { %p158_p5 = scmp.ne.s32.totalorder %s29_s17, %s157_s18  ;;  %p163_p7 = scmp.lt.s32.totalorder %s157_s18, %s157_s18 }
  0x13   :  { %p164_p8 = por %p163_p7, %p162_p6 }
  0x15   :  { %p165_p9 = pnand %p164_p8, %p158_p5 }
  0x17   :  { %168 = shalt.err (!%p165_p9)
}
  0x18   :  { %31 = dma.hbm_to_vmem [thread:$0]  %s231_s1, 32, %s29_s17, [#allocation6]  }
  0x19   :  { %189 = dma.done.wait [#allocation3], 256  }
  0x1a   :  { %190 = vsyncadd [#allocation3], 4294967040 }
  0x1b   :  { %191 = dma.done.wait [#allocation6], 32  }
  0x1c   :  { %192 = vsyncadd [#allocation6], 4294967264  ;;  %v38_v0 = vld [vmem:[#allocation2] sm:$0xff]  ;;  %v39_v1 = vld [vmem:[#allocation2 + $0x8] sm:$0xff]  ;;  %s199_s0 = smov [#allocation7]  }
  0x1d   :  { %42 = vadd.xlane.f32.xlu0 %v38_v0  ;;  %v114_v27 = vld [vmem:[#allocation5] ss:$0 sm:$0xff]  ;;  %v115_v29 = vld [vmem:[#allocation5 + $0x1] ss:$0 sm:$0xff]  ;;  %s101_s1 = sshll.u32 %s199_s0, 4  ;;  %s102_s1 = int_to_ptr.vmem [resolvable:$true] %s101_s1 }
  0x1e   :  { %s169_s21 = scalar_lea.vmem %s102_s1, 256  ;;  %p174_p11 = scmp.lt.s32.totalorder %s102_s1, %s102_s1 }
  0x1f   :  { %p170_p10 = scmp.ne.s32.totalorder %s102_s1, %s169_s21  ;;  %p175_p12 = scmp.lt.s32.totalorder %s169_s21, %s169_s21 }
  0x21   :  { %44 = vadd.xlane.f32.xlu0 %v39_v1  ;;  %p176_p13 = por %p175_p12, %p174_p11 }
  0x23   :  { %p177_p0 = pnand %p176_p13, %p170_p10 }
  0xa6   :  { %v43_v2 = vpop.xlane.xlu0 %42 }
  0xa7   :  { %v47_v3 = vmul.f32 0.0078125, %v43_v2 }
  0xa9   :  { %v49_v4 = vsub.f32 %v38_v0, %v47_v3 }
  0xaa   :  { %v45_v5 = vpop.xlane.xlu0 %44 }
  0xab   :  { %v48_v6 = vmul.f32 0.0078125, %v45_v5  ;;  %v51_v7 = vmul.f32 %v49_v4, %v49_v4 }
  0xad   :  { %v50_v8 = vsub.f32 %v39_v1, %v48_v6  ;;  %53 = vadd.xlane.f32.xlu1 %v51_v7 }
  0xaf   :  { %v52_v9 = vmul.f32 %v50_v8, %v50_v8 }
  0xb1   :  { %55 = vadd.xlane.f32.xlu1 %v52_v9 }
 0x136   :  { %v54_v10 = vpop.xlane.xlu1 %53 }
 0x137   :  { %v58_v11 = vmul.f32 0.007874016, %v54_v10 }
 0x139   :  { %121 = vrsqrt.f32 %v58_v11  ;;  %vm62_vm0 = vcmp.eq.f32.partialorder %v58_v11, inf  ;;  %v65_v16 = vand.u32 2147483648, %v58_v11  ;;  %vm64_vm1 = vcmp.eq.f32.partialorder %v58_v11, 0.0 }
 0x13a   :  { %v56_v12 = vpop.xlane.xlu1 %55 }
 0x13b   :  { %v59_v13 = vmul.f32 0.007874016, %v56_v12 }
 0x13d   :  { %123 = vrsqrt.f32 %v59_v13  ;;  %vm69_vm2 = vcmp.eq.f32.partialorder %v59_v13, inf  ;;  %v72_v22 = vand.u32 2147483648, %v59_v13  ;;  %vm71_vm3 = vcmp.eq.f32.partialorder %v59_v13, 0.0 }
 0x146   :  { %v122_v14 = vpop.eup %121 }
 0x147   :  { %v61_v15 = vmul.f32 %v122_v14, %v58_v11 }
 0x149   :  { %v63_v17 = vsel %vm62_vm0, %v58_v11, %v61_v15 }
 0x14a   :  { %v124_v18 = vpop.eup %123  ;;  %v66_v19 = vsel %vm64_vm1, %v65_v16, %v63_v17 }
 0x14b   :  { %v74_v20 = vadd.f32 1e-06, %v66_v19  ;;  %v68_v21 = vmul.f32 %v124_v18, %v59_v13 }
 0x14d   :  { %125 = vrcp.f32 %v74_v20  ;;  %v70_v23 = vsel %vm69_vm2, %v59_v13, %v68_v21 }
 0x14e   :  { %v73_v24 = vsel %vm71_vm3, %v72_v22, %v70_v23 }
 0x14f   :  { %v75_v25 = vadd.f32 1e-06, %v73_v24 }
 0x151   :  { %127 = vrcp.f32 %v75_v25 }
 0x15a   :  { %v126_v26 = vpop.eup %125 }
 0x15b   :  { %v80_v28 = vmul.f32 %v126_v26, %v49_v4 }
 0x15d   :  { %v86_v30 = vmul.f32 %v114_v27, %v80_v28 }
 0x15e   :  { %v128_v31 = vpop.eup %127 }
 0x15f   :  { %v81_v32 = vmul.f32 %v128_v31, %v50_v8  ;;  %v92_v33 = vadd.f32 %v115_v29, %v86_v30 }
 0x161   :  { %v87_v34 = vmul.f32 %v114_v27, %v81_v32  ;;  %94 = vst [vmem:[#allocation7] sm:$0xff] %v92_v33 }
 0x163   :  { %v93_v35 = vadd.f32 %v115_v29, %v87_v34 }
 0x165   :  { %95 = vst [vmem:[#allocation7 + $0x8] sm:$0xff] %v93_v35 }
 0x166   :  { %180 = shalt.err (!%p177_p0)
}
 0x167   :  { %107 = dma.vmem_to_hbm [thread:$0]  %s102_s1, 256, %s232_s2, [#allocation4], %s196_s12, %s196_s12, %s197_s13  }
 0x168   :  { %193 = dma.done.wait [#allocation4], 256  }
 0x169   :  { %194 = vsyncadd [#allocation4], 4294967040 }
 0x16a   :  { %111 = vsyncpa [#allocation3], 1 }
 0x16b   :  { %112 = vsyncpa [#allocation6], 1 }
 0x16c   :  { %113 = vsyncpa [#allocation4], 1 }

</bundles_post_ra>
